<compile_context>
chip_gen: v7x
topology: tpu7x:2x2x1
jax: 0.10.0
libtpu: 0.0.40
codegen_flags: <defaults>
</compile_context>

<pallas_src>
import functools

import jax
import jax.numpy as jnp
from jax import lax
from jax.experimental import pallas as pl
from jax.experimental.pallas import tpu as pltpu

EPS = 1e-5


# ---------------------------------------------------------------------------
# Kernel bodies
# ---------------------------------------------------------------------------

def _bn_finalize(y, gamma, beta):
    """BatchNorm1d, training mode: batch stats over axis 0, biased variance."""
    mean = jnp.mean(y, axis=0, keepdims=True)
    centered = y - mean
    var = jnp.mean(centered * centered, axis=0, keepdims=True)
    inv_std = lax.rsqrt(var + EPS)
    scale = gamma * inv_std            # (1, tn)
    shift = beta - mean * scale        # (1, tn)
    return y * scale + shift


def _kernel_single_k(x_ref, w_ref, g_ref, b_ref, o_ref):
    # x_ref: (B, E_in) resident (constant block index -> DMA'd exactly once)
    # w_ref: (E_in, tn) pre-transposed weight panel (streams, double-buffered)
    x = x_ref[...]
    w = w_ref[...]
    if x.dtype != w.dtype:
        x = x.astype(w.dtype)          # tiny (B, E_in) cast in VMEM
    y = jnp.dot(x, w, preferred_element_type=jnp.float32)
    o_ref[...] = _bn_finalize(y, g_ref[...], b_ref[...]).astype(o_ref.dtype)


def _kernel_ksplit_inplace(tk, x_ref, w_ref, g_ref, b_ref, o_ref):
    # f32 output: accumulate partial matmuls directly into the resident o_ref.
    k = pl.program_id(1)

    @pl.when(k == 0)
    def _init():
        o_ref[...] = jnp.zeros_like(o_ref)

    start = k * tk
    if tk % 128 == 0:
        start = pl.multiple_of(start, 128)
    x = x_ref[:, pl.ds(start, tk)]
    w = w_ref[...]
    if x.dtype != w.dtype:
        x = x.astype(w.dtype)
    o_ref[...] += jnp.dot(x, w, preferred_element_type=jnp.float32)

    @pl.when(k == pl.num_programs(1) - 1)
    def _finalize():
        o_ref[...] = _bn_finalize(o_ref[...], g_ref[...], b_ref[...])


def _kernel_ksplit_scratch(tk, x_ref, w_ref, g_ref, b_ref, o_ref, acc_ref):
    # Non-f32 output: accumulate in an f32 VMEM scratch, cast on finalize.
    k = pl.program_id(1)

    @pl.when(k == 0)
    def _init():
        acc_ref[...] = jnp.zeros_like(acc_ref)

    start = k * tk
    if tk % 128 == 0:
        start = pl.multiple_of(start, 128)
    x = x_ref[:, pl.ds(start, tk)]
    w = w_ref[...]
    if x.dtype != w.dtype:
        x = x.astype(w.dtype)
    acc_ref[...] += jnp.dot(x, w, preferred_element_type=jnp.float32)

    @pl.when(k == pl.num_programs(1) - 1)
    def _finalize():
        o_ref[...] = _bn_finalize(
            acc_ref[...], g_ref[...], b_ref[...]).astype(o_ref.dtype)


# ---------------------------------------------------------------------------
# Parameter preparation (one-time, parameter-load time)
# ---------------------------------------------------------------------------

def prepare_decoder_params(weight, bias, gamma, beta, *, compute_dtype=None):
    """One-time preparation (amortized over all forward calls):
      * transpose weight to (E_in, E_out) so the kernel contraction is (1,0),
      * optionally cast the weight to compute_dtype (e.g. bf16) here, not per call,
      * drop the Linear bias: training-mode BN mean subtraction cancels it exactly.
    """
    del bias  # exactly cancelled by training-mode BN batch-mean subtraction
    # TODO(synk): if this module is ever run with running/eval BN statistics the
    # bias must be re-added (fold it into `beta` at that point).
    E_out = weight.shape[0]
    w_t = jnp.asarray(weight).T                      # (E_in, E_out), one-time copy
    if compute_dtype is not None:
        w_t = w_t.astype(compute_dtype)
    return {
        "w_t": w_t,
        "gamma": jnp.asarray(gamma, jnp.float32).reshape(1, E_out),
        "beta": jnp.asarray(beta, jnp.float32).reshape(1, E_out),
    }


# ---------------------------------------------------------------------------
# Tiling / VMEM helpers
# ---------------------------------------------------------------------------

def _pick_tile(extent, requested, *, align=128, min_tiles=1):
    """Largest divisor of `extent` that is a multiple of `align`, <= requested,
    and (if possible) yields at least `min_tiles` blocks.  Falls back to the
    full extent (always a legal block) for odd shapes."""
    requested = min(requested, extent)
    if min_tiles > 1 and extent >= min_tiles * align:
        requested = min(requested, max(align, (extent // min_tiles) // align * align))
    best = None
    d = align
    while d <= requested:
        if extent % d == 0:
            best = d
        d += align
    if best is not None:
        return best
    # TODO(synk): pad E_out/E_in to a multiple of 128 at prepare time instead of
    # a single full-extent block (VMEM risk on v7x for very large odd shapes).
    return extent


def _vmem_budget_bytes(default=48 * 1024 * 1024):
    try:
        info = pltpu.get_tpu_info()
        cap = getattr(info, "vmem_capacity_bytes", None)
        if cap:
            return min(int(cap) * 3 // 4, 96 * 1024 * 1024)
    except Exception:
        pass
    return default


# ---------------------------------------------------------------------------
# Forward wrapper
# ---------------------------------------------------------------------------

def decoder_forward(x, params, *, tn=512, tk=2048, vmem_limit_bytes=None,
                    force_k_grid=False):
    """Fused Linear + BatchNorm1d (training-mode batch statistics) forward.

    x:      (B, E_in) activations.
    params: dict from prepare_decoder_params() -- weight already transposed to
            (E_in, E_out) and (optionally) cast to the compute dtype.
    """
    w_t = params["w_t"]
    gamma2 = params["gamma"]
    beta2 = params["beta"]

    B, E_in = x.shape
    E_out = w_t.shape[1]
    out_dtype = x.dtype

    wbytes = jnp.dtype(w_t.dtype).itemsize
    xbytes = jnp.dtype(x.dtype).itemsize
    obytes = jnp.dtype(out_dtype).itemsize

    budget = int(vmem_limit_bytes) if vmem_limit_bytes else _vmem_budget_bytes()
    headroom = 0.7

    # >= 2 tiles on the parallel N axis when E_out allows it (v7x has 2 TCs;
    # the extra grid step is negligible on single-TC v5e/v6e).
    min_n_tiles = 2 if E_out >= 256 else 1
    tn = _pick_tile(E_out, tn, min_tiles=min_n_tiles)

    # Resident VMEM (independent of tk): x (double-buffered, conservative),
    # output tile, and a possible f32 scratch.
    resident = 2 * B * E_in * xbytes + 2 * B * tn * obytes + B * tn * 4
    single_k_bytes = resident + 2 * E_in * tn * wbytes
    use_single_k = (not force_k_grid) and single_k_bytes <= headroom * budget

    if use_single_k:
        grid = (E_out // tn,)
        in_specs = [
            pl.BlockSpec((B, E_in), lambda j: (0, 0)),      # x: resident, one DMA
            pl.BlockSpec((E_in, tn), lambda j: (0, j)),     # weight panel streams
            pl.BlockSpec((1, tn), lambda j: (0, j)),
            pl.BlockSpec((1, tn), lambda j: (0, j)),
        ]
        out_specs = pl.BlockSpec((B, tn), lambda j: (0, j))
        scratch_shapes = []
        kernel = _kernel_single_k
        dims = ("parallel",)
    else:
        # K-split: cap tk by the VMEM budget, keep x resident (never re-streamed).
        tk_budget_elems = max(128, int((headroom * budget - resident)
                                       // max(1, 2 * tn * wbytes)))
        tk_req = max(128, min(tk, tk_budget_elems))
        tk = _pick_tile(E_in, tk_req, min_tiles=2)
        grid = (E_out // tn, E_in // tk)
        in_specs = [
            pl.BlockSpec((B, E_in), lambda j, k: (0, 0)),   # x: resident, one DMA
            pl.BlockSpec((tk, tn), lambda j, k: (k, j)),    # pre-transposed weight
            pl.BlockSpec((1, tn), lambda j, k: (0, j)),
            pl.BlockSpec((1, tn), lambda j, k: (0, j)),
        ]
        out_specs = pl.BlockSpec((B, tn), lambda j, k: (0, j))
        if out_dtype == jnp.float32:
            kernel = functools.partial(_kernel_ksplit_inplace, tk)
            scratch_shapes = []
        else:
            kernel = functools.partial(_kernel_ksplit_scratch, tk)
            scratch_shapes = [pltpu.VMEM((B, tn), jnp.float32)]
        dims = ("parallel", "arbitrary")

    return pl.pallas_call(
        kernel,
        out_shape=jax.ShapeDtypeStruct((B, E_out), out_dtype),
        grid_spec=pltpu.PrefetchScalarGridSpec(
            num_scalar_prefetch=0,
            grid=grid,
            in_specs=in_specs,
            out_specs=out_specs,
            scratch_shapes=scratch_shapes,
        ),
        compiler_params=pltpu.CompilerParams(
            dimension_semantics=dims,
            vmem_limit_bytes=int(budget),
        ),
    )(x, w_t, gamma2, beta2)


def reference_forward(x, weight, bias, gamma, beta):
    """Pure-JAX reference matching PyTorch Linear + BatchNorm1d (training mode)."""
    y = x @ weight.T + bias
    mean = jnp.mean(y, axis=0, keepdims=True)
    var = jnp.mean((y - mean) ** 2, axis=0, keepdims=True)
    return (y - mean) / jnp.sqrt(var + EPS) * gamma + beta


# ---------------------------------------------------------------------------
# Demo / correctness check
# ---------------------------------------------------------------------------

if __name__ == "__main__":
    # Small but lane-aligned shape (emb_dim multiple of 128 so tiling, the
    # 2-way parallel N axis, and unmasked lane-dense stores are all exercised).
    B, E = 8, 256
    key = jax.random.PRNGKey(0)
    kx, kw, kb = jax.random.split(key, 3)

    x = jax.random.normal(kx, (B, E), dtype=jnp.float32)

    bound = 1.0 / (E ** 0.5)
    weight = jax.random.uniform(kw, (E, E), jnp.float32, -bound, bound)  # (out, in)
    bias = jax.random.uniform(kb, (E,), jnp.float32, -bound, bound)
    gamma = jnp.ones((E,), jnp.float32)   # BatchNorm1d weight init
    beta = jnp.zeros((E,), jnp.float32)   # BatchNorm1d bias init

    ref = reference_forward(x, weight, bias, gamma, beta)

    # 1) f32 params, single-K path (grid collapses to 1-D over N): tight check.
    params_f32 = prepare_decoder_params(weight, bias, gamma, beta)
    out = jax.block_until_ready(decoder_forward(x, params_f32))
    assert out.shape == (B, E)
    assert jnp.allclose(out, ref, atol=2e-4, rtol=2e-4), "f32 single-K mismatch"

    # 2) f32, forced K-split (exercises the in-place f32 accumulator kernel).
    out_ks = jax.block_until_ready(
        decoder_forward(x, params_f32, tn=128, tk=128, force_k_grid=True))
    assert jnp.allclose(out_ks, ref, atol=2e-4, rtol=2e-4), "f32 K-split mismatch"

    # 3) bf16 weights prepared once at load time (halves weight HBM traffic).
    params_bf16 = prepare_decoder_params(weight, bias, gamma, beta,
                                         compute_dtype=jnp.bfloat16)
    out_bf16 = jax.block_until_ready(decoder_forward(x, params_bf16))
    assert jnp.allclose(out_bf16, ref, atol=3e-2, rtol=3e-2), "bf16 mismatch"

    # 4) bf16 activations + weights, forced K-split (f32 scratch accumulator,
    #    bf16 output).
    out_bf16b = jax.block_until_ready(
        decoder_forward(x.astype(jnp.bfloat16), params_bf16,
                        tn=128, tk=128, force_k_grid=True))
    assert jnp.allclose(out_bf16b.astype(jnp.float32), ref,
                        atol=5e-2, rtol=5e-2), "bf16 K-split mismatch"

    print("KERNEL_OK")
</pallas_src>

<mosaic_0001>
module attributes {stable_mosaic.version = 11 : i64} {
  func.func @_kernel_single_k(%arg0: i32, %arg1: memref<8x256xf32, #tpu.memory_space<vmem>>, %arg2: memref<256x128xf32, #tpu.memory_space<vmem>>, %arg3: memref<1x128xf32, #tpu.memory_space<vmem>>, %arg4: memref<1x128xf32, #tpu.memory_space<vmem>>, %arg5: memref<8x128xf32, #tpu.memory_space<vmem>>) attributes {dimension_semantics = [#tpu.dimension_semantics<parallel>], iteration_bounds = array<i64: 2>, scalar_prefetch = 0 : i64, scratch_operands = 0 : i64, tpu.core_type = #tpu.core_type<tc>, window_params = [{pipeline_mode = #tpu.pipeline_mode<synchronous>, transform_indices = @transform_0, window_bounds = array<i64: 8, 256>}, {transform_indices = @transform_1, window_bounds = array<i64: 256, 128>}, {transform_indices = @transform_2, window_bounds = array<i64: 1, 128>}, {transform_indices = @transform_3, window_bounds = array<i64: 1, 128>}, {transform_indices = @transform_4, window_bounds = array<i64: 8, 128>}]} {
    %c0 = arith.constant 0 : index
    %c0_0 = arith.constant 0 : index
    %0 = vector.load %arg1[%c0, %c0_0] : memref<8x256xf32, #tpu.memory_space<vmem>>, vector<8x256xf32>
    %c0_1 = arith.constant 0 : index
    %c0_2 = arith.constant 0 : index
    %1 = vector.load %arg2[%c0_1, %c0_2] : memref<256x128xf32, #tpu.memory_space<vmem>>, vector<256x128xf32>
    %cst = arith.constant dense<0.000000e+00> : vector<8x128xf32>
    %2 = tpu.matmul %0, %1, %cst {dimension_numbers = #tpu.dot_dimension_numbers<[1], [0], [0], [1], [0, 0, 1, 1], [], []>} : vector<8x256xf32>, vector<256x128xf32>, vector<8x128xf32> -> vector<8x128xf32>
    %c0_3 = arith.constant 0 : index
    %c0_4 = arith.constant 0 : index
    %3 = vector.load %arg3[%c0_3, %c0_4] : memref<1x128xf32, #tpu.memory_space<vmem>>, vector<1x128xf32>
    %c0_5 = arith.constant 0 : index
    %c0_6 = arith.constant 0 : index
    %4 = vector.load %arg4[%c0_5, %c0_6] : memref<1x128xf32, #tpu.memory_space<vmem>>, vector<1x128xf32>
    %cst_7 = arith.constant dense<0.000000e+00> : vector<128xf32>
    %5 = vector.multi_reduction <add>, %2, %cst_7 [0] : vector<8x128xf32> to vector<128xf32>
    %6 = vector.shape_cast %5 : vector<128xf32> to vector<1x128xf32>
    %cst_8 = arith.constant 8.000000e+00 : f32
    %7 = vector.broadcast %cst_8 : f32 to vector<1x128xf32>
    %8 = arith.divf %6, %7 : vector<1x128xf32>
    %9 = vector.broadcast %8 : vector<1x128xf32> to vector<8x128xf32>
    %10 = arith.subf %2, %9 : vector<8x128xf32>
    %11 = arith.mulf %10, %10 : vector<8x128xf32>
    %cst_9 = arith.constant dense<0.000000e+00> : vector<128xf32>
    %12 = vector.multi_reduction <add>, %11, %cst_9 [0] : vector<8x128xf32> to vector<128xf32>
    %13 = vector.shape_cast %12 : vector<128xf32> to vector<1x128xf32>
    %cst_10 = arith.constant 8.000000e+00 : f32
    %14 = vector.broadcast %cst_10 : f32 to vector<1x128xf32>
    %15 = arith.divf %13, %14 : vector<1x128xf32>
    %cst_11 = arith.constant 9.99999974E-6 : f32
    %16 = vector.broadcast %cst_11 : f32 to vector<1x128xf32>
    %17 = arith.addf %15, %16 : vector<1x128xf32>
    %18 = math.rsqrt %17 : vector<1x128xf32>
    %19 = arith.mulf %3, %18 : vector<1x128xf32>
    %20 = arith.mulf %8, %19 : vector<1x128xf32>
    %21 = arith.subf %4, %20 : vector<1x128xf32>
    %22 = vector.broadcast %19 : vector<1x128xf32> to vector<8x128xf32>
    %23 = arith.mulf %2, %22 : vector<8x128xf32>
    %24 = vector.broadcast %21 : vector<1x128xf32> to vector<8x128xf32>
    %25 = arith.addf %23, %24 : vector<8x128xf32>
    %c0_12 = arith.constant 0 : index
    %c0_13 = arith.constant 0 : index
    %26 = vector.load %arg5[%c0_12, %c0_13] : memref<8x128xf32, #tpu.memory_space<vmem>>, vector<8x128xf32>
    tpu.vector_store %arg5[%c0_12, %c0_13], %25 {strides = array<i32>} : memref<8x128xf32, #tpu.memory_space<vmem>>, vector<8x128xf32>,
    return
  }
  func.func @transform_0(%arg0: i32) -> (i32, i32) {
    %c0_i32 = arith.constant 0 : i32
    %c0_i32_0 = arith.constant 0 : i32
    %c0_i32_1 = arith.constant 0 : i32
    return %c0_i32, %c0_i32_0 : i32, i32
  }
  func.func @transform_1(%arg0: i32) -> (i32, i32) {
    %c0_i32 = arith.constant 0 : i32
    %c0_i32_0 = arith.constant 0 : i32
    return %c0_i32, %arg0 : i32, i32
  }
  func.func @transform_2(%arg0: i32) -> (i32, i32) {
    %c0_i32 = arith.constant 0 : i32
    %c0_i32_0 = arith.constant 0 : i32
    return %c0_i32, %arg0 : i32, i32
  }
  func.func @transform_3(%arg0: i32) -> (i32, i32) {
    %c0_i32 = arith.constant 0 : i32
    %c0_i32_0 = arith.constant 0 : i32
    return %c0_i32, %arg0 : i32, i32
  }
  func.func @transform_4(%arg0: i32) -> (i32, i32) {
    %c0_i32 = arith.constant 0 : i32
    %c0_i32_0 = arith.constant 0 : i32
    return %c0_i32, %arg0 : i32, i32
  }
}

</mosaic_0001>

<bundles_post_ra>
// kernel: tpu_custom_call.1
= control target key start
LH: loop header
LB: loop body
LE: loop exit
PB: predicated region body
PF: predicated region fallthrough
CT: control target
= control target key end

     0   :  { %9 = vsyncpa [#allocation3], 0  ;;  %s1056_s0 = inlined_call_operand.hbm [shape: f32[8,256], index: 0, kind: input, shape index: {}]   ;;  %s1057_s1 = inlined_call_operand.hbm [shape: f32[256,256], index: 1, kind: input, shape index: {}]   ;;  %s1058_s2 = inlined_call_operand.vmem [shape: f32[1,256], index: 2, kind: input, shape index: {}]   ;;  %s1059_s3 = inlined_call_operand.vmem [shape: f32[1,256], index: 3, kind: input, shape index: {}]   ;;  %s1060_s4 = inlined_call_operand.hbm [shape: f32[8,256], index: 4, kind: output, shape index: {}]  }
   0x1   :  { %10 = vsyncpa [#allocation6], 0 }
   0x2   :  { %12 = vsyncpa [#allocation6 + $0x1], 0 }
   0x3   :  { %13 = vsyncpa [#allocation4], 0 }
   0x4   :  { %15 = vsyncpa [#allocation4 + $0x1], 0  ;;  %s817_s15 = smov 0   ;;  %s819_s16 = smov 0  }
   0x5   :  { %s821_s17 = smov 0   ;;  %s823_s18 = smov 0  }
   0x6 LB: > { %s838_s19 = sadd.s32 4294967295, %s784_s18   ;;  %s513_s20 = sadd.s32 4294967294, %s784_s18   ;;  %s784_s18 = sphi %s823_s18, %s1085_s18   ;;  %s780_s17 = sphi %s821_s17, %s1084_s17   ;;  %s776_s16 = sphi %s819_s16, %s1083_s16   ;;  %s772_s15 = sphi %s817_s15, %s1082_s15  }
   0x7   : > { %s842_s21 = sadd.s32 1, %s784_s18   ;;  %s49_s22 = sadd.s32 1, %s780_s17 }
   0x8   : > { %s46_s23 = ssub.s32 %s784_s18, %s842_s21  ;;  %p56_p0 = scmp.ne.s32.totalorder %s780_s17, %s776_s16 }
   0x9   : > { %p47_p1 = scmp.eq.s32.totalorder %s46_s23, 0  ;;  %p57_p2 = scmp.eq.s32.totalorder %s784_s18, 0 }
   0xa   : > { %p62_p3 = scmp.ne.s32.totalorder %s776_s16, %s772_s15  ;;  %p1061_p4 = scmp.eq.s32.totalorder %s838_s19, 0 }
   0xb   : > { %s854_s24 = scalar_select %p47_p1, %s780_s17, %s49_s22  }
   0xc   : > { %p856_p5 = por %p57_p2, %p56_p0  ;;  %p862_p6 = por %p1061_p4, %p62_p3 }
   0xd   : > { %p138_p7 = scmp.eq.s32.totalorder %s838_s19, 1  ;;  %p144_p8 = scmp.eq.s32.totalorder %s513_s20, 1 }
   0xe   : > { %s1067_s26 = scalar_select %p862_p6, 1, 0 }
   0xf   : > { %p514_p9 = scmp.ge.s32.totalorder %s784_s18, 1  ;;  %p151_p10 = scmp.lt.s32.totalorder %s784_s18, 3 }
  0x10   : > { %p869_p11 = por %p138_p7, %p56_p0  ;;  %p873_p12 = por %p144_p8, %p62_p3 }
  0x11   : > { %p877_p13 = pnand %p514_p9, %p151_p10  ;;  %s786_s30 = smov [#allocation2]  }
  0x12   : > { %s1068_s27 = scalar_select %p869_p11, 1, 0 }
  0x13   : > { %s1069_s28 = scalar_select %p873_p12, 1, 0 }
  0x14   : > { %s1070_s29 = scalar_select %p877_p13, 1, 0 }
  0x15   : > { %p602_p2 = pneg %p877_p13  ;;  %s164_s5 = sshll.u32 %s786_s30, 4  ;;  %s165_s5 = int_to_ptr.vmem [resolvable:$true] %s164_s5 }
  0x16   : > { %p615_p4 = scmp.lt.s32.totalorder %s784_s18, 2  ;;  %p1071_p0 = scmp.eq.s32.totalorder %s838_s19, 0 }
  0x17   : > { %s175_s7 = sand.u32 1, %s780_s17   ;;  %s656_s12 = scalar_lea.hbm %s1056_s0, 256 }
  0x18   : > { %p887_p7 = pnand %p602_p2, %p1071_p0  ;;  %p894_p3 = pnand %p615_p4, %p856_p5 }
  0x19   : > { %s517_s9 = sshll.u32 %s175_s7, 8  ;;  %p657_p8 = scmp.ne.s32.totalorder %s1056_s0, %s656_s12 }
  0x1a   : > { %s1073_s8 = scalar_select %p894_p3, 1, 0 }
  0x1b   : > { %p658_p9 = pneg %p887_p7  ;;  %p663_p4 = scmp.lt.u32.totalorder %s656_s12, %s1056_s0 }
  0x1d   : > { %p659_p10 = pnand %p658_p9, %p657_p8 }
  0x1f   : > { %p660_p2 = pneg %p659_p10 }
  0x21   : > { %p665_p5 = pnand %p663_p4, %p660_p2 }
  0x23   : > { %668 = shalt.err (!%p665_p5)
}
  0x24   : > { %s669_s23 = scalar_lea.vmem %s165_s5, 256  ;;  %p677_p11 = scmp.lt.s32.totalorder %s165_s5, %s165_s5 }
  0x25   : > { %p670_p0 = scmp.ne.s32.totalorder %s165_s5, %s669_s23  ;;  %p678_p6 = scmp.lt.s32.totalorder %s669_s23, %s669_s23 }
  0x27   : > { %p672_p1 = pnand %p670_p0, %p658_p9  ;;  %p679_p13 = por %p678_p6, %p677_p11 }
  0x29   : > { %p673_p12 = pneg %p672_p1 }
  0x2b   : > { %p680_p3 = pnand %p679_p13, %p673_p12 }
  0x2d   : > { %683 = shalt.err (!%p680_p3)
}
  0x2e   : > { %605 = dma.hbm_to_vmem [thread:$0]  (!%p887_p7), %s1056_s0, 256, %s165_s5, [#allocation3]  }
  0x2f   : > { %s518_s10 = sshll.u32 %s784_s18, 7  ;;  %s179_s11 = scalar_lea.vmem [#allocation5], %s517_s9 }
  0x30   : > { %s185_s12 = sshll.u32 %s179_s11, 4  ;;  %s918_s20 = scalar_lea.hbm %s1057_s1, %s518_s10  ;;  %s920_s12 = int_to_ptr.vmem [resolvable:$true] %s185_s12 }
  0x31   : > { %s922_s6 = scalar_lea.sflag [#allocation6], %s175_s7  ;;  %s684_s22 = scalar_lea.hbm %s918_s20, 4096 }
  0x32   : > { %p685_p6 = scmp.ne.s32.totalorder %s918_s20, %s684_s22  ;;  %p1074_p11 = scmp.ne.s32.totalorder %s1073_s8, 0 }
  0x33   : > { %s689_s23 = scalar_lea.hbm %s1057_s1, 8192  ;;  %p690_p7 = scmp.lt.u32.totalorder %s918_s20, %s1057_s1 }
  0x34   : > { %p686_p12 = pneg %p1074_p11  ;;  %p691_p3 = scmp.lt.u32.totalorder %s689_s23, %s684_s22 }
  0x35   : > { %p693_p9 = scmp.lt.u32.totalorder %s684_s22, %s918_s20 }
  0x36   : > { %p687_p13 = pnand %p686_p12, %p685_p6  ;;  %p692_p8 = por %p691_p3, %p690_p7 }
  0x38   : > { %p688_p1 = pneg %p687_p13  ;;  %p694_p10 = por %p693_p9, %p692_p8 }
  0x3a   : > { %p695_p2 = pnand %p694_p10, %p688_p1 }
  0x3c   : > { %698 = shalt.err (!%p695_p2)
}
  0x3d   : > { %s699_s7 = scalar_lea.vmem %s920_s12, 4096  ;;  %s787_s10 = smov [#allocation5]  }
  0x3e   : > { %p700_p4 = scmp.ne.s32.totalorder %s920_s12, %s699_s7  ;;  %s704_s11 = sshll.u32 %s787_s10, 4  ;;  %s705_s11 = int_to_ptr.vmem [resolvable:$false] %s704_s11 }
  0x3f   : > { %s706_s13 = scalar_lea.vmem %s705_s11, 8192  ;;  %p707_p6 = scmp.lt.s32.totalorder %s920_s12, %s705_s11 }
  0x40   : > { %p702_p5 = pnand %p700_p4, %p686_p12  ;;  %p708_p13 = scmp.lt.s32.totalorder %s706_s13, %s699_s7 }
  0x42   : > { %p703_p0 = pneg %p702_p5  ;;  %p709_p7 = por %p708_p13, %p707_p6 }
  0x44   : > { %p710_p3 = pnand %p709_p7, %p703_p0 }
  0x46   : > { %713 = shalt.err (!%p710_p3)
}
  0x47   : > { %s788_s14 = smov 256   ;;  %s789_s22 = smov 128  }
  0x48   : > { %s790_s5 = smov 8   ;;  %p1075_p12 = scmp.ne.s32.totalorder %s1070_s29, 0 }
  0x49   : > { %609 = dma.hbm_to_vmem [thread:$0]  (!%p1074_p11), %s918_s20, 4096, %s920_s12, %s922_s6, %s788_s14, %s789_s22, %s790_s5  }
  0x4a   : > { %209 = sbr.rel (%p1075_p12) target bundleno = 405 (0x195), region = 36  ;;  %p1076_p1 = scmp.eq.s32.totalorder (!%p1075_p12), %s838_s19, 0 }
  0x51   : > { %759 = dma.done.wait (%p1076_p1), [#allocation3], 256   ;;  %p1077_p8 = pmov %p1076_p1 }
  0x52   : > { %s957_s9 = sand.u32 1, %s776_s16   ;;  %p1078_p11 = scmp.ne.s32.totalorder %s1067_s26, 0 }
  0x53   : > { %761 = vsyncadd (%p1077_p8), [#allocation3], 4294967040  ;;  %s521_s23 = sshll.u32 %s957_s9, 8  ;;  %s216_s25 = scalar_lea.sflag [#allocation6], %s957_s9 }
  0x54   : > { %s961_s30 = scalar_lea.vmem [#allocation5], %s521_s23 }
  0x55   : > { %763 = dma.done.wait (%p1078_p11), %s216_s25, 4096  }
  0x56   : > { %765 = vsyncadd (%p1078_p11), %s216_s25, 4294963200  ;;  %v274_v0 = vld [vmem:[%s961_s30 + $0x80] sm:$0xff]  ;;  %v275_v1 = vld [vmem:[%s961_s30 + $0x88] sm:$0xff]  ;;  %p250_p9 = scmp.lt.s32.totalorder %s838_s19, 1  ;;  %s522_s10 = sshll.u32 %s957_s9, 3 }
  0x57   : > { %v258_v2 = vld [vmem:[%s961_s30] sm:$0xff]  ;;  %v562_v3 = vpack.c.bf16 %v275_v1, %v274_v0  ;;  %v259_v4 = vld [vmem:[%s961_s30 + $0x8] sm:$0xff]  ;;  %v276_v5 = vld [vmem:[%s961_s30 + $0x90] sm:$0xff]  ;;  %s524_s11 = sshll.u32 %s838_s19, 7  ;;  %s249_s13 = scalar_lea.vmem [#allocation7], %s522_s10 }
  0x58   : > { %v277_v6 = vld [vmem:[%s961_s30 + $0x98] sm:$0xff]  ;;  %v564_v7 = vpack.c.bf16 %v259_v4, %v258_v2  ;;  %v260_v9 = vld [vmem:[%s961_s30 + $0x10] sm:$0xff]  ;;  %v278_v11 = vld [vmem:[%s961_s30 + $0xa0] sm:$0xff]  ;;  %s251_s26 = scalar_select %p250_p9, %s838_s19, 1 }
  0x59   : > { %v566_v8 = vpack.c.bf16 %v277_v6, %v276_v5  ;;  %v261_v10 = vld [vmem:[%s961_s30 + $0x18] sm:$0xff]  ;;  %563 = vmatprep.subr.bf16.mxu0 %v562_v3  ;;  %v279_v12 = vld [vmem:[%s961_s30 + $0xa8] sm:$0xff]  ;;  %v262_v15 = vld [vmem:[%s961_s30 + $0x20] sm:$0xff]  ;;  %v385_v6 = vlaneseq  ;;  %s413_s14 = sshll.u32 %s249_s13, 4  ;;  %s1012_s23 = scalar_lea.hbm %s1060_s4, %s524_s11  ;;  %s1014_s14 = int_to_ptr.vmem [resolvable:$true] %s413_s14 }
  0x5a   : > { %565 = vmatpush3.bf16.msra.mxu0 %v564_v7  ;;  %v568_v13 = vpack.c.bf16 %v261_v10, %v260_v9  ;;  %v570_v14 = vpack.c.bf16 %v279_v12, %v278_v11  ;;  %v263_v16 = vld [vmem:[%s961_s30 + $0x28] sm:$0xff]  ;;  %v280_v17 = vld [vmem:[%s961_s30 + $0xb0] sm:$0xff]  ;;  %v281_v18 = vld [vmem:[%s961_s30 + $0xb8] sm:$0xff]  ;;  %s252_s12 = scalar_lea.vmem %s1058_s2, %s251_s26  ;;  %s255_s7 = scalar_lea.vmem %s1059_s3, %s251_s26 }
  0x5b   : > { %567 = vmatprep.subr.bf16.mxu0 %v566_v8  ;;  %v572_v19 = vpack.c.bf16 %v263_v16, %v262_v15  ;;  %v574_v20 = vpack.c.bf16 %v281_v18, %v280_v17  ;;  %v264_v21 = vld [vmem:[%s961_s30 + $0x30] sm:$0xff]  ;;  %v265_v22 = vld [vmem:[%s961_s30 + $0x38] sm:$0xff]  ;;  %v282_v23 = vld [vmem:[%s961_s30 + $0xc0] sm:$0xff]  ;;  %v386_v7 = vshrl.u32 %v385_v6, 7  ;;  %s400_s25 = scalar_lea.sflag [#allocation4], %s957_s9  ;;  %p1079_p2 = scmp.ne.s32.totalorder %s1068_s27, 0 }
  0x5c   : > { %v283_v24 = vld [vmem:[%s961_s30 + $0xc8] sm:$0xff]  ;;  %v257_v25 = vld [vmem:[#allocation2 + $0x8] sm:$0xff]  ;;  %v576_v26 = vpack.c.bf16 %v265_v22, %v264_v21  ;;  %v266_v28 = vld [vmem:[%s961_s30 + $0x40] sm:$0xff]  ;;  %s791_s19 = smov [#allocation7]  }
  0x5d   : > { %354 = vmatprep.mubr.f32.mxu0 %v257_v25  ;;  %v578_v27 = vpack.c.bf16 %v283_v24, %v282_v23  ;;  %v267_v29 = vld [vmem:[%s961_s30 + $0x48] sm:$0xff]  ;;  %v284_v30 = vld [vmem:[%s961_s30 + $0xd0] sm:$0xff]  ;;  %v285_v31 = vld [vmem:[%s961_s30 + $0xd8] sm:$0xff]  ;;  %v387_v9 = vsub.s32 0, %v386_v7  ;;  %s718_s26 = sshll.u32 %s791_s19, 4  ;;  %s719_s26 = int_to_ptr.vmem [resolvable:$false] %s718_s26 }
  0x5e   : > { %569 = vmatpush3.bf16.msra.mxu0 %v568_v13  ;;  %v580_v32 = vpack.c.bf16 %v267_v29, %v266_v28  ;;  %v582_v33 = vpack.c.bf16 %v285_v31, %v284_v30  ;;  %v268_v34 = vld [vmem:[%s961_s30 + $0x50] sm:$0xff]  ;;  %v269_v35 = vld [vmem:[%s961_s30 + $0x58] sm:$0xff]  ;;  %v286_v36 = vld [vmem:[%s961_s30 + $0xe0] sm:$0xff]  ;;  %s720_s29 = scalar_lea.vmem %s719_s26, 256  ;;  %p721_p0 = scmp.lt.s32.totalorder %s1014_s14, %s719_s26 }
  0x5f   : > { %571 = vmatprep.subr.bf16.mxu0 %v570_v14  ;;  %v287_v37 = vld [vmem:[%s961_s30 + $0xe8] sm:$0xff]  ;;  %v584_v38 = vpack.c.bf16 %v269_v35, %v268_v34  ;;  %v270_v40 = vld [vmem:[%s961_s30 + $0x60] sm:$0xff]  ;;  %v288_v42 = vld [vmem:[%s961_s30 + $0xf0] sm:$0xff] }
  0x60   : > { %v586_v39 = vpack.c.bf16 %v287_v37, %v286_v36  ;;  %v271_v41 = vld [vmem:[%s961_s30 + $0x68] sm:$0xff]  ;;  %v289_v43 = vld [vmem:[%s961_s30 + $0xf8] sm:$0xff]  ;;  %v272_v46 = vld [vmem:[%s961_s30 + $0x70] sm:$0xff] }
  0x61   : > { %v588_v44 = vpack.c.bf16 %v271_v41, %v270_v40  ;;  %v590_v45 = vpack.c.bf16 %v289_v43, %v288_v42  ;;  %v273_v47 = vld [vmem:[%s961_s30 + $0x78] sm:$0xff]  ;;  %v256_v49 = vld [vmem:[#allocation2] sm:$0xff]  ;;  %s714_s30 = scalar_lea.vmem %s1014_s14, 128 }
  0x62   : > { %573 = vmatpush3.bf16.msra.mxu0 %v572_v19  ;;  %v592_v48 = vpack.c.bf16 %v273_v47, %v272_v46  ;;  %v360_v8 = vld [vmem:[%s252_s12] sm:$0x1]  ;;  %p715_p10 = scmp.ne.s32.totalorder %s1014_s14, %s714_s30  ;;  %p722_p6 = scmp.lt.s32.totalorder %s720_s29, %s714_s30 }
  0x63   : > { %575 = vmatprep.subr.bf16.mxu0 %v574_v20  ;;  %v361_v12 = vld [vmem:[%s255_s7] sm:$0x1] }
  0x64   : > { %p716_p4 = pnand %p715_p10, %p1079_p2  ;;  %p723_p13 = por %p722_p6, %p721_p0 }
  0x66   : > { %577 = vmatpush3.bf16.msra.mxu0 %v576_v26  ;;  %p717_p5 = pneg %p716_p4 }
  0x67   : > { %579 = vmatprep.subr.bf16.mxu0 %v578_v27 }
  0x68   : > { %p724_p7 = pnand %p723_p13, %p717_p5 }
  0x6a   : > { %581 = vmatpush3.bf16.msra.mxu0 %v580_v32 }
  0x6b   : > { %583 = vmatprep.subr.bf16.mxu0 %v582_v33 }
  0x6e   : > { %585 = vmatpush3.bf16.msra.mxu0 %v584_v38 }
  0x6f   : > { %587 = vmatprep.subr.bf16.mxu0 %v586_v39 }
  0x72   : > { %589 = vmatpush3.bf16.msra.mxu0 %v588_v44 }
  0x73   : > { %591 = vmatprep.subr.bf16.mxu0 %v590_v45 }
  0x76   : > { %593 = vmatpush3.bf16.msra.mxu0 %v592_v48 }
  0x79   : > { %355 = vmatmul.mubr.f32.vlgmr.msra.gmra.mrb[0].mxu0 %v256_v49 }
 0x14c   : > { %v559_v50 = vpop.f32.mrb[0].mxu0 }
 0x14d   : > { %v560_v51 = vpop.f32.mrb[1].mxu0 }
 0x14e   : > { %v561_v52 = vadd.f32 %v560_v51, %v559_v50 }
 0x150   : > { %v362_v53 = vrot.slane %v561_v52, 4 }
 0x152   : > { %v363_v54 = vadd.f32 %v561_v52, %v362_v53 }
 0x154   : > { %v364_v55 = vrot.slane %v363_v54, 2 }
 0x156   : > { %v365_v56 = vadd.f32 %v364_v55, %v363_v54 }
 0x158   : > { %v366_v57 = vrot.slane %v365_v56, 1 }
 0x15a   : > { %v367_v58 = vadd.f32 %v366_v57, %v365_v56 }
 0x15c   : > { %v369_v59 = vmul.f32 0.125, %v367_v58 }
 0x15e   : > { %v370_v60 = vsub.f32 %v561_v52, %v369_v59 }
 0x160   : > { %v371_v61 = vmul.f32 %v370_v60, %v370_v60 }
 0x162   : > { %v372_v62 = vrot.slane %v371_v61, 4 }
 0x164   : > { %v373_v63 = vadd.f32 %v372_v62, %v371_v61 }
 0x166   : > { %v374_v0 = vrot.slane %v373_v63, 2 }
 0x168   : > { %v375_v1 = vadd.f32 %v374_v0, %v373_v63 }
 0x16a   : > { %v376_v2 = vrot.slane %v375_v1, 1 }
 0x16c   : > { %v377_v3 = vadd.f32 %v376_v2, %v375_v1 }
 0x16e   : > { %v378_v4 = vmul.f32 0.125, %v377_v3 }
 0x170   : > { %v379_v5 = vadd.f32 1e-05, %v378_v4 }
 0x172   : > { %654 = vrsqrt.f32 %v379_v5 }
 0x17c   : > { %v655_v10 = vpop.eup %654 }
 0x17d   : > { %v381_v11 = vmul.f32 %v655_v10, %v360_v8 }
 0x17f   : > { %v382_v13 = vmul.f32 %v381_v11, %v369_v59  ;;  %v388_v14 = vrot.slane %v381_v11, %v387_v9 }
 0x181   : > { %v383_v15 = vsub.f32 %v361_v12, %v382_v13  ;;  %v390_v16 = vmul.f32 %v561_v52, %v388_v14 }
 0x183   : > { %v395_v17 = vrot.slane %v383_v15, %v387_v9 }
 0x185   : > { %v397_v18 = vadd.f32 %v395_v17, %v390_v16 }
 0x187   : > { %398 = vst [vmem:[%s249_s13] sm:$0xff] %v397_v18 }
 0x188   : > { %727 = shalt.err (!%p724_p7)
}
 0x189   : > { %s728_s9 = scalar_lea.hbm %s1012_s23, 128  ;;  %s732_s20 = scalar_lea.hbm %s1060_s4, 256 }
 0x18a   : > { %p729_p3 = scmp.ne.s32.totalorder %s1012_s23, %s728_s9  ;;  %p733_p8 = scmp.lt.u32.totalorder %s1012_s23, %s1060_s4 }
 0x18b   : > { %p734_p11 = scmp.lt.u32.totalorder %s732_s20, %s728_s9  ;;  %p736_p10 = scmp.lt.u32.totalorder %s728_s9, %s1012_s23 }
 0x18c   : > { %p730_p12 = pnand %p729_p3, %p1079_p2 }
 0x18d   : > { %p735_p9 = por %p734_p11, %p733_p8 }
 0x18e   : > { %p731_p1 = pneg %p730_p12 }
 0x18f   : > { %p737_p4 = por %p736_p10, %p735_p9 }
 0x191   : > { %p738_p5 = pnand %p737_p4, %p731_p1 }
 0x193   : > { %741 = shalt.err (!%p738_p5)
}
 0x194   : > { %600 = dma.vmem_to_hbm [thread:$0]  (%p1079_p2), %s1014_s14, 128, %s1012_s23, %s400_s25  }
 0x195 PF: > { %s425_s10 = sand.u32 1, %s772_s15   ;;  %p1080_p0 = scmp.ne.s32.totalorder %s1069_s28, 0 }
 0x196   : > { %p1081_p6 = scmp.ge.s32.totalorder %s784_s18, 2  ;;  %s426_s11 = scalar_lea.sflag [#allocation4], %s425_s10 }
 0x198   : > { %p611_p13 = pnand %p1081_p6, %p1080_p0 }
 0x19a   : > { %767 = dma.done.wait (!%p611_p13), %s426_s11, 128  }
 0x19b   : > { %769 = vsyncadd (!%p611_p13), %s426_s11, 4294967168  ;;  %p18_p7 = scmp.ge.s32.totalorder %s842_s21, 4   ;;  %s1082_s15 = smov %s776_s16 }
 0x19c   : > { %s1083_s16 = smov %s780_s17  ;;  %s1084_s17 = smov %s854_s24 }
 0x19d   : > { %s1085_s18 = smov %s842_s21  ;;  %20 = sbr.rel (!%p18_p7) target bundleno = 6 (0x6), region = 92 }
 0x1a4   :  { %431 = vsyncpa [#allocation3], 1 }
 0x1a5   :  { %433 = vsyncpa [#allocation3 + $0x1], 1 }
 0x1a6   :  { %434 = vsyncpa [#allocation6], 1 }
 0x1a7   :  { %436 = vsyncpa [#allocation6 + $0x1], 1 }
 0x1a8   :  { %437 = vsyncpa [#allocation4], 1 }
 0x1a9   :  { %439 = vsyncpa [#allocation4 + $0x1], 1 }

</bundles_post_ra>
